<compile_context>
chip_gen: v6e
topology: v6e:2x2x1
jax: 0.10.0
libtpu: 0.0.40
codegen_flags: <defaults>
</compile_context>

<pallas_src>
import jax
import jax.numpy as jnp
from jax.experimental import pallas as pl
from jax.experimental.pallas import tpu as pltpu

STATE_DIM = 27
ACTION_DIM = 5          # ['pass', 'shoot', 'dribble', 'defend', 'idle']
H1 = 128
H2 = 64

H2_PAD = 128            # fc2 output padded to a full 128-lane tile
OUT_PAD = 128           # fc3 output padded to a full 128-lane tile (lane-dense stores)
TILE_B_DEFAULT = 1024   # rows of the batch per grid step


def _round_up(n, m):
    return (n + m - 1) // m * m


def dqn_kernel(x_ref, w1_ref, b1_ref, w2_ref, b2_ref, w3_ref, b3_ref, o_ref):
    # fc1 -> relu   (bf16 inputs/weights, f32 accumulation, f32 bias)
    h1 = jnp.dot(x_ref[...], w1_ref[...],
                 preferred_element_type=jnp.float32) + b1_ref[...]
    h1 = jnp.maximum(h1, 0.0)
    # fc2 -> relu   (output padded to 128 lanes; padded columns stay exactly zero)
    h2 = jnp.dot(h1.astype(jnp.bfloat16), w2_ref[...],
                 preferred_element_type=jnp.float32) + b2_ref[...]
    h2 = jnp.maximum(h2, 0.0)
    # fc3           (lane-dense 128-wide output block; caller slices to ACTION_DIM)
    o_ref[...] = jnp.dot(h2.astype(jnp.bfloat16), w3_ref[...],
                         preferred_element_type=jnp.float32) + b3_ref[...]


def pack_params(params):
    """Cast weights to bf16 and zero-pad fc2/fc3 to lane-dense 128-wide layers."""
    w1, b1, w2, b2, w3, b3 = params
    w1p = w1.astype(jnp.bfloat16)                                   # (27, 128)
    b1p = b1.reshape(1, H1).astype(jnp.float32)                     # (1, 128)
    w2p = jnp.zeros((H1, H2_PAD), jnp.float32).at[:, :H2].set(w2).astype(jnp.bfloat16)
    b2p = jnp.zeros((1, H2_PAD), jnp.float32).at[:, :H2].set(b2.reshape(1, H2))
    w3p = jnp.zeros((H2_PAD, OUT_PAD), jnp.float32).at[:H2, :ACTION_DIM].set(w3).astype(jnp.bfloat16)
    b3p = jnp.zeros((1, OUT_PAD), jnp.float32).at[:, :ACTION_DIM].set(b3.reshape(1, ACTION_DIM))
    return (w1p, b1p, w2p, b2p, w3p, b3p)


def dqn_forward(x, packed, tile_b=TILE_B_DEFAULT):
    """x: [B, STATE_DIM] float32.  Returns [B, ACTION_DIM] float32 Q-values."""
    w1p, b1p, w2p, b2p, w3p, b3p = packed
    B = x.shape[0]
    # For small batches use a single full-array block; otherwise tile at tile_b rows.
    tb = min(tile_b, _round_up(B, 8))
    B_pad = _round_up(B, tb)

    x_bf = x.astype(jnp.bfloat16)
    if B_pad != B:
        x_bf = jnp.pad(x_bf, ((0, B_pad - B), (0, 0)))

    out_full = pl.pallas_call(
        dqn_kernel,
        out_shape=jax.ShapeDtypeStruct((B_pad, OUT_PAD), jnp.float32),
        grid=(B_pad // tb,),
        in_specs=[
            pl.BlockSpec((tb, STATE_DIM), lambda i: (i, 0)),        # x tile (pipelined)
            pl.BlockSpec((STATE_DIM, H1), lambda i: (0, 0)),        # w1 (resident)
            pl.BlockSpec((1, H1), lambda i: (0, 0)),                # b1
            pl.BlockSpec((H1, H2_PAD), lambda i: (0, 0)),           # w2 (padded)
            pl.BlockSpec((1, H2_PAD), lambda i: (0, 0)),            # b2
            pl.BlockSpec((H2_PAD, OUT_PAD), lambda i: (0, 0)),      # w3 (padded)
            pl.BlockSpec((1, OUT_PAD), lambda i: (0, 0)),           # b3
        ],
        out_specs=pl.BlockSpec((tb, OUT_PAD), lambda i: (i, 0)),    # lane-dense out tile
        compiler_params=pltpu.CompilerParams(
            dimension_semantics=("parallel",),
            vmem_limit_bytes=64 * 1024 * 1024,
        ),
    )(x_bf, w1p, b1p, w2p, b2p, w3p, b3p)

    return out_full[:B, :ACTION_DIM]


def init_params(key):
    """Deterministic init mimicking nn.Linear default (uniform +/- 1/sqrt(fan_in))."""
    def linear(key, fan_in, fan_out):
        kw, kb = jax.random.split(key)
        bound = 1.0 / jnp.sqrt(jnp.float32(fan_in))
        # stored transposed relative to PyTorch: [in, out]
        w = jax.random.uniform(kw, (fan_in, fan_out), jnp.float32, -bound, bound)
        b = jax.random.uniform(kb, (1, fan_out), jnp.float32, -bound, bound)
        return w, b

    k1, k2, k3 = jax.random.split(key, 3)
    w1, b1 = linear(k1, STATE_DIM, H1)
    w2, b2 = linear(k2, H1, H2)
    w3, b3 = linear(k3, H2, ACTION_DIM)
    return (w1, b1, w2, b2, w3, b3)


def dqn_reference_bf16(x, packed):
    """Pure-JAX reference matching the kernel's bf16 numerics exactly."""
    w1p, b1p, w2p, b2p, w3p, b3p = packed
    xb = x.astype(jnp.bfloat16)
    h1 = jnp.maximum(jnp.dot(xb, w1p, preferred_element_type=jnp.float32) + b1p, 0.0)
    h2 = jnp.maximum(jnp.dot(h1.astype(jnp.bfloat16), w2p,
                             preferred_element_type=jnp.float32) + b2p, 0.0)
    out = jnp.dot(h2.astype(jnp.bfloat16), w3p,
                  preferred_element_type=jnp.float32) + b3p
    return out[:, :ACTION_DIM]


def dqn_reference_f32(x, params):
    w1, b1, w2, b2, w3, b3 = params
    h1 = jnp.maximum(x @ w1 + b1, 0.0)
    h2 = jnp.maximum(h1 @ w2 + b2, 0.0)
    return h2 @ w3 + b3


if __name__ == "__main__":
    key = jax.random.PRNGKey(0)
    kx, kx2, kp = jax.random.split(key, 3)

    params = init_params(kp)
    packed = pack_params(params)

    # Small latency-path batch (single full-array block).
    B = 8
    x = jax.random.normal(kx, (B, STATE_DIM), dtype=jnp.float32)
    out = jax.block_until_ready(dqn_forward(x, packed))
    assert out.shape == (B, ACTION_DIM)
    assert jnp.allclose(out, dqn_reference_bf16(x, packed), atol=2e-3, rtol=2e-3)
    assert jnp.allclose(out, dqn_reference_f32(x, params), atol=5e-2, rtol=5e-2)

    # Larger batch exercising the batch grid + padding (2050 -> 3 tiles of 1024).
    B2 = 2050
    x2 = jax.random.normal(kx2, (B2, STATE_DIM), dtype=jnp.float32)
    out2 = jax.block_until_ready(dqn_forward(x2, packed))
    assert out2.shape == (B2, ACTION_DIM)
    assert jnp.allclose(out2, dqn_reference_bf16(x2, packed), atol=2e-3, rtol=2e-3)
    assert jnp.allclose(out2, dqn_reference_f32(x2, params), atol=5e-2, rtol=5e-2)

    print("KERNEL_OK")
</pallas_src>

<mosaic_0001>
module attributes {stable_mosaic.version = 11 : i64} {
  func.func @dqn_kernel(%arg0: i32, %arg1: memref<8x27xbf16, #tpu.memory_space<vmem>>, %arg2: memref<27x128xbf16, #tpu.memory_space<vmem>>, %arg3: memref<1x128xf32, #tpu.memory_space<vmem>>, %arg4: memref<128x128xbf16, #tpu.memory_space<vmem>>, %arg5: memref<1x128xf32, #tpu.memory_space<vmem>>, %arg6: memref<128x128xbf16, #tpu.memory_space<vmem>>, %arg7: memref<1x128xf32, #tpu.memory_space<vmem>>, %arg8: memref<8x128xf32, #tpu.memory_space<vmem>>) attributes {dimension_semantics = [#tpu.dimension_semantics<parallel>], iteration_bounds = array<i64: 1>, scalar_prefetch = 0 : i64, scratch_operands = 0 : i64, tpu.core_type = #tpu.core_type<tc>, window_params = [{transform_indices = @transform_0, window_bounds = array<i64: 8, 27>}, {pipeline_mode = #tpu.pipeline_mode<synchronous>, transform_indices = @transform_1, window_bounds = array<i64: 27, 128>}, {pipeline_mode = #tpu.pipeline_mode<synchronous>, transform_indices = @transform_2, window_bounds = array<i64: 1, 128>}, {pipeline_mode = #tpu.pipeline_mode<synchronous>, transform_indices = @transform_3, window_bounds = array<i64: 128, 128>}, {pipeline_mode = #tpu.pipeline_mode<synchronous>, transform_indices = @transform_4, window_bounds = array<i64: 1, 128>}, {pipeline_mode = #tpu.pipeline_mode<synchronous>, transform_indices = @transform_5, window_bounds = array<i64: 128, 128>}, {pipeline_mode = #tpu.pipeline_mode<synchronous>, transform_indices = @transform_6, window_bounds = array<i64: 1, 128>}, {transform_indices = @transform_7, window_bounds = array<i64: 8, 128>}]} {
    %c0 = arith.constant 0 : index
    %c0_0 = arith.constant 0 : index
    %0 = vector.load %arg1[%c0, %c0_0] : memref<8x27xbf16, #tpu.memory_space<vmem>>, vector<8x27xbf16>
    %c0_1 = arith.constant 0 : index
    %c0_2 = arith.constant 0 : index
    %1 = vector.load %arg2[%c0_1, %c0_2] : memref<27x128xbf16, #tpu.memory_space<vmem>>, vector<27x128xbf16>
    %cst = arith.constant dense<0.000000e+00> : vector<8x128xf32>
    %2 = tpu.matmul %0, %1, %cst {dimension_numbers = #tpu.dot_dimension_numbers<[1], [0], [0], [1], [0, 0, 1, 1], [], []>} : vector<8x27xbf16>, vector<27x128xbf16>, vector<8x128xf32> -> vector<8x128xf32>
    %c0_3 = arith.constant 0 : index
    %c0_4 = arith.constant 0 : index
    %3 = vector.load %arg3[%c0_3, %c0_4] : memref<1x128xf32, #tpu.memory_space<vmem>>, vector<1x128xf32>
    %4 = vector.broadcast %3 : vector<1x128xf32> to vector<8x128xf32>
    %5 = arith.addf %2, %4 : vector<8x128xf32>
    %cst_5 = arith.constant 0.000000e+00 : f32
    %6 = vector.broadcast %cst_5 : f32 to vector<8x128xf32>
    %7 = arith.maximumf %5, %6 : vector<8x128xf32>
    %8 = arith.truncf %7 : vector<8x128xf32> to vector<8x128xbf16>
    %c0_6 = arith.constant 0 : index
    %c0_7 = arith.constant 0 : index
    %9 = vector.load %arg4[%c0_6, %c0_7] : memref<128x128xbf16, #tpu.memory_space<vmem>>, vector<128x128xbf16>
    %cst_8 = arith.constant dense<0.000000e+00> : vector<8x128xf32>
    %10 = tpu.matmul %8, %9, %cst_8 {dimension_numbers = #tpu.dot_dimension_numbers<[1], [0], [0], [1], [0, 0, 1, 1], [], []>} : vector<8x128xbf16>, vector<128x128xbf16>, vector<8x128xf32> -> vector<8x128xf32>
    %c0_9 = arith.constant 0 : index
    %c0_10 = arith.constant 0 : index
    %11 = vector.load %arg5[%c0_9, %c0_10] : memref<1x128xf32, #tpu.memory_space<vmem>>, vector<1x128xf32>
    %12 = vector.broadcast %11 : vector<1x128xf32> to vector<8x128xf32>
    %13 = arith.addf %10, %12 : vector<8x128xf32>
    %cst_11 = arith.constant 0.000000e+00 : f32
    %14 = vector.broadcast %cst_11 : f32 to vector<8x128xf32>
    %15 = arith.maximumf %13, %14 : vector<8x128xf32>
    %16 = arith.truncf %15 : vector<8x128xf32> to vector<8x128xbf16>
    %c0_12 = arith.constant 0 : index
    %c0_13 = arith.constant 0 : index
    %17 = vector.load %arg6[%c0_12, %c0_13] : memref<128x128xbf16, #tpu.memory_space<vmem>>, vector<128x128xbf16>
    %cst_14 = arith.constant dense<0.000000e+00> : vector<8x128xf32>
    %18 = tpu.matmul %16, %17, %cst_14 {dimension_numbers = #tpu.dot_dimension_numbers<[1], [0], [0], [1], [0, 0, 1, 1], [], []>} : vector<8x128xbf16>, vector<128x128xbf16>, vector<8x128xf32> -> vector<8x128xf32>
    %c0_15 = arith.constant 0 : index
    %c0_16 = arith.constant 0 : index
    %19 = vector.load %arg7[%c0_15, %c0_16] : memref<1x128xf32, #tpu.memory_space<vmem>>, vector<1x128xf32>
    %20 = vector.broadcast %19 : vector<1x128xf32> to vector<8x128xf32>
    %21 = arith.addf %18, %20 : vector<8x128xf32>
    %c0_17 = arith.constant 0 : index
    %c0_18 = arith.constant 0 : index
    %22 = vector.load %arg8[%c0_17, %c0_18] : memref<8x128xf32, #tpu.memory_space<vmem>>, vector<8x128xf32>
    tpu.vector_store %arg8[%c0_17, %c0_18], %21 {strides = array<i32>} : memref<8x128xf32, #tpu.memory_space<vmem>>, vector<8x128xf32>,
    return
  }
  func.func @transform_0(%arg0: i32) -> (i32, i32) {
    %c0_i32 = arith.constant 0 : i32
    %c0_i32_0 = arith.constant 0 : i32
    return %arg0, %c0_i32 : i32, i32
  }
  func.func @transform_1(%arg0: i32) -> (i32, i32) {
    %c0_i32 = arith.constant 0 : i32
    %c0_i32_0 = arith.constant 0 : i32
    %c0_i32_1 = arith.constant 0 : i32
    return %c0_i32, %c0_i32_0 : i32, i32
  }
  func.func @transform_2(%arg0: i32) -> (i32, i32) {
    %c0_i32 = arith.constant 0 : i32
    %c0_i32_0 = arith.constant 0 : i32
    %c0_i32_1 = arith.constant 0 : i32
    return %c0_i32, %c0_i32_0 : i32, i32
  }
  func.func @transform_3(%arg0: i32) -> (i32, i32) {
    %c0_i32 = arith.constant 0 : i32
    %c0_i32_0 = arith.constant 0 : i32
    %c0_i32_1 = arith.constant 0 : i32
    return %c0_i32, %c0_i32_0 : i32, i32
  }
  func.func @transform_4(%arg0: i32) -> (i32, i32) {
    %c0_i32 = arith.constant 0 : i32
    %c0_i32_0 = arith.constant 0 : i32
    %c0_i32_1 = arith.constant 0 : i32
    return %c0_i32, %c0_i32_0 : i32, i32
  }
  func.func @transform_5(%arg0: i32) -> (i32, i32) {
    %c0_i32 = arith.constant 0 : i32
    %c0_i32_0 = arith.constant 0 : i32
    %c0_i32_1 = arith.constant 0 : i32
    return %c0_i32, %c0_i32_0 : i32, i32
  }
  func.func @transform_6(%arg0: i32) -> (i32, i32) {
    %c0_i32 = arith.constant 0 : i32
    %c0_i32_0 = arith.constant 0 : i32
    %c0_i32_1 = arith.constant 0 : i32
    return %c0_i32, %c0_i32_0 : i32, i32
  }
  func.func @transform_7(%arg0: i32) -> (i32, i32) {
    %c0_i32 = arith.constant 0 : i32
    %c0_i32_0 = arith.constant 0 : i32
    return %arg0, %c0_i32 : i32, i32
  }
}

</mosaic_0001>

<bundles_post_ra>
// kernel: tpu_custom_call.1
= control target key start
LH: loop header
LB: loop body
LE: loop exit
PB: predicated region body
PF: predicated region fallthrough
CT: control target
= control target key end

     0   :  { %12 = vsyncpa [#allocation3], 0  ;;  %s733_s0 = inlined_call_operand.hbm [shape: bf16[8,27], index: 0, kind: input, shape index: {}]   ;;  %s734_s1 = inlined_call_operand.hbm [shape: bf16[27,128], index: 1, kind: input, shape index: {}]   ;;  %s735_s2 = inlined_call_operand.vmem [shape: f32[1,128], index: 2, kind: input, shape index: {}]   ;;  %s736_s3 = inlined_call_operand.hbm [shape: bf16[128,128], index: 3, kind: input, shape index: {}]   ;;  %s737_s4 = inlined_call_operand.vmem [shape: f32[1,128], index: 4, kind: input, shape index: {}]   ;;  %s738_s5 = inlined_call_operand.hbm [shape: bf16[128,128], index: 5, kind: input, shape index: {}]   ;;  %s739_s6 = inlined_call_operand.vmem [shape: f32[1,128], index: 6, kind: input, shape index: {}]   ;;  %s740_s7 = inlined_call_operand.hbm [shape: f32[8,128], index: 7, kind: output, shape index: {}]  }
   0x1   :  { %13 = vsyncpa [#allocation6], 0 }
   0x2   :  { %14 = vsyncpa [#allocation9], 0 }
   0x3   :  { %15 = vsyncpa [#allocation4], 0  ;;  %s626_s24 = smov [#allocation5]  }
   0x4   :  { %s31_s25 = sshll.u32 %s626_s24, 4  ;;  %s32_s25 = int_to_ptr.vmem [resolvable:$true] %s31_s25 }
   0x5   :  { %s526_s26 = scalar_lea.vmem %s32_s25, 256  ;;  %p531_p1 = scmp.lt.s32.totalorder %s32_s25, %s32_s25 }
   0x6   :  { %p527_p0 = scmp.ne.s32.totalorder %s32_s25, %s526_s26  ;;  %p532_p2 = scmp.lt.s32.totalorder %s526_s26, %s526_s26 }
   0x8   :  { %p533_p3 = por %p532_p2, %p531_p1 }
   0xa   :  { %p534_p4 = pnand %p533_p3, %p527_p0 }
   0xc   :  { %537 = shalt.err (!%p534_p4)
}
   0xd   :  { %s627_s27 = smov 64   ;;  %s628_s28 = smov 4  }
   0xe   :  { %37 = dma.hbm_to_vmem [thread:$0]  %s734_s1, 256, %s32_s25, [#allocation6], %s627_s27, %s627_s27, %s628_s28  }
   0xf   :  { %s629_s8 = smov [#allocation2]   ;;  %s630_s10 = smov [#allocation7]  }
  0x10   :  { %s22_s9 = sshll.u32 %s629_s8, 4  ;;  %s45_s11 = sshll.u32 %s630_s10, 4  ;;  %s23_s9 = int_to_ptr.vmem [resolvable:$true] %s22_s9  ;;  %s46_s11 = int_to_ptr.vmem [resolvable:$true] %s45_s11 }
  0x11   :  { %s546_s12 = scalar_lea.vmem %s23_s9, 64  ;;  %p551_p6 = scmp.lt.s32.totalorder %s23_s9, %s23_s9 }
  0x12   :  { %p547_p5 = scmp.ne.s32.totalorder %s23_s9, %s546_s12  ;;  %p552_p7 = scmp.lt.s32.totalorder %s546_s12, %s546_s12 }
  0x14   :  { %p553_p8 = por %p552_p7, %p551_p6 }
  0x16   :  { %p554_p9 = pnand %p553_p8, %p547_p5 }
  0x18   :  { %557 = shalt.err (!%p554_p9)
}
  0x19   :  { %25 = dma.hbm_to_vmem [thread:$0]  %s733_s0, 64, %s23_s9, [#allocation3]  }
  0x1a   :  { %s566_s15 = scalar_lea.vmem %s46_s11, 1024  ;;  %p571_p11 = scmp.lt.s32.totalorder %s46_s11, %s46_s11 }
  0x1b   :  { %p567_p10 = scmp.ne.s32.totalorder %s46_s11, %s566_s15  ;;  %p572_p12 = scmp.lt.s32.totalorder %s566_s15, %s566_s15 }
  0x1d   :  { %p573_p13 = por %p572_p12, %p571_p11 }
  0x1f   :  { %p574_p0 = pnand %p573_p13, %p567_p10 }
  0x21   :  { %577 = shalt.err (!%p574_p0)
}
  0x22   :  { %51 = dma.hbm_to_vmem [thread:$0]  %s736_s3, 1024, %s46_s11, [#allocation6], %s627_s27, %s627_s27, %s628_s28  }
  0x23   :  { %s631_s17 = smov [#allocation8]  }
  0x24   :  { %s59_s18 = sshll.u32 %s631_s17, 4  ;;  %s60_s18 = int_to_ptr.vmem [resolvable:$true] %s59_s18 }
  0x25   :  { %s586_s19 = scalar_lea.vmem %s60_s18, 1024  ;;  %p591_p2 = scmp.lt.s32.totalorder %s60_s18, %s60_s18 }
  0x26   :  { %p587_p1 = scmp.ne.s32.totalorder %s60_s18, %s586_s19  ;;  %p592_p3 = scmp.lt.s32.totalorder %s586_s19, %s586_s19 }
  0x28   :  { %p593_p4 = por %p592_p3, %p591_p2 }
  0x2a   :  { %p594_p5 = pnand %p593_p4, %p587_p1 }
  0x2c   :  { %597 = shalt.err (!%p594_p5)
}
  0x2d   :  { %65 = dma.hbm_to_vmem [thread:$0]  %s738_s5, 1024, %s60_s18, [#allocation9], %s627_s27, %s627_s27, %s628_s28  }
  0x2e   :  { %618 = dma.done.wait [#allocation3], 64  }
  0x2f   :  { %619 = vsyncadd [#allocation3], 4294967232 }
  0x30   :  { %620 = dma.done.wait [#allocation6], 1280  }
  0x31   :  { %621 = vsyncadd [#allocation6], 4294966016 }
  0x32   :  { %622 = dma.done.wait [#allocation9], 1024  }
  0x33   :  { %623 = vsyncadd [#allocation9], 4294966272  ;;  %vm108_vm0 = vcmask 1044480   ;;  %v632_v0 = vmov 0.0   ;;  %vm633_vm1 = vmmov 0   ;;  %vm109_vm2 = vcmask 1045504  }
  0x34   :  { %442 = vmatprep.subr.bf16.mxu0 %v632_v0  ;;  %450 = vmatprep.subr.bf16.mxu1 %v632_v0  ;;  %v634_v1 = vmov 65535   ;;  %v500_v4 = vld [vmem:[#allocation5 + $0x8] sm:$0x3f]   ;;  %v501_v7 = vld [vmem:[#allocation5] sm:$0xff]   ;;  %v81_v9 = vld [vmem:[#allocation2] sm:$0xf] }
  0x35   :  { %446 = vmatprep.mubr.msk.bf16.mxu0 %vm633_vm1, %v632_v0  ;;  %466 = vmatprep.mubr.msk.bf16.mxu1 %vm633_vm1, %v632_v0  ;;  %v110_v2 = vsel %vm108_vm0, 4294967295, %v634_v1  ;;  %v502_v6 = vld [vmem:[#allocation7 + $0x38] sm:$0xff]   ;;  %v503_v8 = vld [vmem:[#allocation7 + $0x30] sm:$0xff]   ;;  %vm104_vm3 = vcmask 220160   ;;  %v504_v10 = vld [vmem:[#allocation7 + $0x28] sm:$0xff]   ;;  %s635_s24 = smov [#allocation10]  }
  0x36   :  { %v111_v3 = vsel %vm109_vm2, %v110_v2, 0  ;;  %451 = vmatpush3.bf16.msra.mxu1 %v502_v6  ;;  %v505_v11 = vld [vmem:[#allocation7 + $0x20] sm:$0xff]   ;;  %v506_v12 = vld [vmem:[#allocation7 + $0x18] sm:$0xff]   ;;  %v507_v13 = vld [vmem:[#allocation7 + $0x10] sm:$0xff]   ;;  %s388_s25 = sshll.u32 %s635_s24, 4  ;;  %s389_s25 = int_to_ptr.vmem [resolvable:$true] %s388_s25 }
  0x37   :  { %v113_v5 = vand.u32 %v500_v4, %v111_v3  ;;  %452 = vmatprep.subr.bf16.mxu1 %v632_v0  ;;  %v508_v14 = vld [vmem:[#allocation7 + $0x8] sm:$0xff]   ;;  %v509_v15 = vld [vmem:[#allocation7] sm:$0xff]   ;;  %v510_v16 = vld [vmem:[#allocation8 + $0x38] sm:$0xff]   ;;  %p603_p7 = scmp.lt.s32.totalorder %s389_s25, %s389_s25 }
  0x38   :  { %v511_v17 = vld [vmem:[#allocation8 + $0x30] sm:$0xff]   ;;  %v512_v18 = vld [vmem:[#allocation8 + $0x28] sm:$0xff]   ;;  %v513_v19 = vld [vmem:[#allocation8 + $0x20] sm:$0xff]  }
  0x39   :  { %443 = vmatpush3.bf16.msra.mxu0 %v113_v5  ;;  %v514_v20 = vld [vmem:[#allocation8 + $0x18] sm:$0xff]   ;;  %v515_v21 = vld [vmem:[#allocation8 + $0x10] sm:$0xff]   ;;  %v399_v22 = vld [vmem:[%s735_s2] ss:$0 sm:$0xff] }
  0x3a   :  { %444 = vmatprep.subr.bf16.mxu0 %v632_v0  ;;  %453 = vmatpush3.bf16.msra.mxu1 %v503_v8  ;;  %v516_v30 = vld [vmem:[#allocation8 + $0x8] sm:$0xff]   ;;  %v517_v31 = vld [vmem:[#allocation8] sm:$0xff]  }
  0x3b   :  { %454 = vmatprep.subr.bf16.mxu1 %v632_v0  ;;  %v403_v32 = vld [vmem:[%s737_s4] ss:$0 sm:$0xff]  ;;  %s598_s4 = scalar_lea.vmem %s389_s25, 128 }
  0x3c   :  { %v412_v40 = vld [vmem:[%s739_s6] ss:$0 sm:$0xff]  ;;  %p599_p6 = scmp.ne.s32.totalorder %s389_s25, %s598_s4  ;;  %p604_p8 = scmp.lt.s32.totalorder %s598_s4, %s598_s4 }
  0x3d   :  { %445 = vmatpush3.bf16.msra.mxu0 %v501_v7 }
  0x3e   :  { %470 = vmatprep.subr.bf16.mxu0 %v632_v0  ;;  %455 = vmatpush3.bf16.msra.mxu1 %v504_v10  ;;  %p605_p9 = por %p604_p8, %p603_p7 }
  0x3f   :  { %456 = vmatprep.subr.bf16.mxu1 %v632_v0 }
  0x40   :  { %447 = vmatmul.mubr.msk.bf16.vlgmr.msra.gmra.mxu0 %vm104_vm3, %v81_v9  ;;  %p606_p10 = pnand %p605_p9, %p599_p6 }
  0x41   :  { %486 = vmatprep.mubr.msk.bf16.mxu0 %vm633_vm1, %v632_v0  ;;  %471 = vmatpush3.bf16.msra.mxu0 %v510_v16 }
  0x42   :  { %457 = vmatpush3.bf16.msra.mxu1 %v505_v11  ;;  %472 = vmatprep.subr.bf16.mxu0 %v632_v0 }
  0x43   :  { %458 = vmatprep.subr.bf16.mxu1 %v632_v0 }
  0x45   :  { %473 = vmatpush3.bf16.msra.mxu0 %v511_v17 }
  0x46   :  { %459 = vmatpush3.bf16.msra.mxu1 %v506_v12  ;;  %474 = vmatprep.subr.bf16.mxu0 %v632_v0 }
  0x47   :  { %460 = vmatprep.subr.bf16.mxu1 %v632_v0 }
  0x49   :  { %475 = vmatpush3.bf16.msra.mxu0 %v512_v18 }
  0x4a   :  { %461 = vmatpush3.bf16.msra.mxu1 %v507_v13  ;;  %476 = vmatprep.subr.bf16.mxu0 %v632_v0 }
  0x4b   :  { %462 = vmatprep.subr.bf16.mxu1 %v632_v0 }
  0x4d   :  { %477 = vmatpush3.bf16.msra.mxu0 %v513_v19 }
  0x4e   :  { %463 = vmatpush3.bf16.msra.mxu1 %v508_v14  ;;  %478 = vmatprep.subr.bf16.mxu0 %v632_v0 }
  0x4f   :  { %464 = vmatprep.subr.bf16.mxu1 %v632_v0 }
  0x51   :  { %479 = vmatpush3.bf16.msra.mxu0 %v514_v20 }
  0x52   :  { %465 = vmatpush3.bf16.msra.mxu1 %v509_v15  ;;  %480 = vmatprep.subr.bf16.mxu0 %v632_v0 }
  0x55   :  { %481 = vmatpush3.bf16.msra.mxu0 %v515_v21 }
  0x56   :  { %482 = vmatprep.subr.bf16.mxu0 %v632_v0 }
  0x59   :  { %483 = vmatpush3.bf16.msra.mxu0 %v516_v30 }
  0x5a   :  { %484 = vmatprep.subr.bf16.mxu0 %v632_v0 }
  0x5d   :  { %485 = vmatpush3.bf16.msra.mxu0 %v517_v31 }
 0x100   :  { %v149_v23 = vpop.f32.mrf.mxu0 }
 0x101   :  { %v150_v24 = vadd.f32 %v399_v22, %v149_v23 }
 0x102   :  { %v448_v25 = vpop.f32.mrf.mxu0 }
 0x103   :  { %v155_v26 = vmax.f32 %v150_v24, 0.0 }
 0x104   :  { %v152_v27 = vpop.f32.mrf.mxu0 }
 0x105   :  { %v156_v28 = vpack.c.bf16 %v155_v26, %v155_v26 }
 0x106   :  { %v449_v29 = vpop.f32.mrf.mxu0 }
 0x107   :  { %467 = vmatmul.mubr.bf16.vlgmr.msra.gmra.mxu1 %v156_v28 }
 0x1c7   :  { %v262_v33 = vpop.f32.mrf.mxu1 }
 0x1c8   :  { %v263_v34 = vadd.f32 %v403_v32, %v262_v33 }
 0x1c9   :  { %v468_v35 = vpop.f32.mrf.mxu1 }
 0x1ca   :  { %v268_v36 = vmax.f32 %v263_v34, 0.0 }
 0x1cb   :  { %v265_v37 = vpop.f32.mrf.mxu1 }
 0x1cc   :  { %v269_v38 = vpack.c.bf16 %v268_v36, %v268_v36 }
 0x1cd   :  { %v469_v39 = vpop.f32.mrf.mxu1 }
 0x1ce   :  { %487 = vmatmul.mubr.bf16.vlgmr.msra.gmra.mxu0 %v269_v38 }
 0x28e   :  { %v375_v41 = vpop.f32.mrf.mxu0 }
 0x28f   :  { %v376_v42 = vadd.f32 %v412_v40, %v375_v41 }
 0x290   :  { %v488_v43 = vpop.f32.mrf.mxu0 }
 0x291   :  { %381 = vst [vmem:[#allocation10] sm:$0xff] %v376_v42 }
 0x292   :  { %v378_v44 = vpop.f32.mrf.mxu0 }
 0x293   :  { %609 = shalt.err (!%p606_p10)
}
 0x294   :  { %391 = dma.vmem_to_hbm [thread:$0]  %s389_s25, 128, %s740_s7, [#allocation4]   ;;  %v489_v45 = vpop.f32.mrf.mxu0 }
 0x295   :  { %624 = dma.done.wait [#allocation4], 128  }
 0x296   :  { %625 = vsyncadd [#allocation4], 4294967168 }
 0x297   :  { %395 = vsyncpa [#allocation3], 1 }
 0x298   :  { %396 = vsyncpa [#allocation6], 1 }
 0x299   :  { %397 = vsyncpa [#allocation9], 1 }
 0x29a   :  { %398 = vsyncpa [#allocation4], 1 }

</bundles_post_ra>
